<compile_context>
chip_gen: v5e
topology: v5e:2x2
jax: 0.10.0
libtpu: 0.0.40
codegen_flags: <defaults>
</compile_context>

<pallas_src>
import functools

import jax
import jax.numpy as jnp
from jax.experimental import pallas as pl
from jax.experimental.pallas import tpu as pltpu

LANES = 128
SUBLANES = 8
MAX_TILE_ROWS = 2048  # (2048, 128) f32 = 1 MiB per input block (safe on v5e/v6e/v7x)


def _round_up(x, m):
    return ((x + m - 1) // m) * m


def _focal_loss_kernel(pred_ref, target_ref, out_ref, *, alpha, gamma):
    pred = pred_ref[...].astype(jnp.float32)
    target = target_ref[...].astype(jnp.float32)

    # weight[target == 0] = 1 - alpha ; weight[target > 1e-5] = alpha ; else 0
    weight = jnp.where(target == 0.0, jnp.float32(1.0 - alpha), jnp.float32(0.0))
    weight = jnp.where(target > 1e-5, jnp.float32(alpha), weight)

    # Single exp(-|x|) feeds both log-sigmoids and the sigmoid.
    t = jnp.exp(-jnp.abs(pred))                      # EUP: exp
    softplus = jnp.log1p(t)                          # EUP: log1p  (= log(1+e^{-|x|}))
    log_sigmoid = jnp.minimum(pred, 0.0) - softplus
    log_sigmoid_inv = jnp.minimum(-pred, 0.0) - softplus
    inv_1pt = 1.0 / (1.0 + t)                        # EUP: reciprocal (full precision)
    # sigmoid(x) = 1/(1+t) for x>=0, t/(1+t) for x<0 (no cancellation).
    sigmoid_pred = jnp.where(pred >= 0.0, jnp.float32(1.0), t) * inv_1pt

    d = jnp.abs(sigmoid_pred - target)
    g = float(gamma)
    if g == round(g) and 0.0 <= g <= 8.0:
        # small integer gamma: repeated multiplies (pure VALU), avoids exp/log pow
        gi = int(round(g))
        dpow = jnp.ones_like(d)
        for _ in range(gi):
            dpow = dpow * d
    else:
        dpow = jnp.power(d, jnp.float32(g))

    coef = weight * dpow
    loss = target * log_sigmoid + (1.0 - target) * log_sigmoid_inv
    val = coef * loss                                # (tile_rows, 128)

    tr = val.shape[0]
    # Reduce to a single (8,128) vreg tile with pure VALU adds (no XLU).
    partial = jnp.sum(val.reshape(tr // SUBLANES, SUBLANES, LANES), axis=0)
    out_ref[...] = partial[None, :, :]


def focal_loss_with_logits_neg_soft_loss(pred, target, *, alpha, gamma):
    assert pred.shape == target.shape
    n = pred.size

    rows_needed = -(-n // LANES)
    tile_rows = min(MAX_TILE_ROWS, _round_up(max(rows_needed, 1), SUBLANES))
    padded_rows = _round_up(rows_needed, tile_rows)
    n_pad = padded_rows * LANES
    pad = n_pad - n

    # Keep native dtype in HBM; cast inside the kernel.
    pred_flat = pred.reshape(-1)
    target_flat = target.reshape(-1)
    if pad:
        # Sentinel target = -1.0: target != 0 and target <= 1e-5 -> weight == 0,
        # so padded elements contribute exactly zero (no mask stream needed).
        pred_flat = jnp.pad(pred_flat, (0, pad))
        target_flat = jnp.pad(target_flat, (0, pad),
                              constant_values=jnp.asarray(-1.0, target.dtype))

    pred_2d = pred_flat.reshape(padded_rows, LANES)
    target_2d = target_flat.reshape(padded_rows, LANES)

    num_blocks = padded_rows // tile_rows
    kernel = functools.partial(_focal_loss_kernel,
                               alpha=float(alpha), gamma=float(gamma))

    in_spec = pl.BlockSpec((tile_rows, LANES), lambda i: (i, 0))

    partials = pl.pallas_call(
        kernel,
        out_shape=jax.ShapeDtypeStruct((num_blocks, SUBLANES, LANES), jnp.float32),
        grid_spec=pltpu.PrefetchScalarGridSpec(
            num_scalar_prefetch=0,
            grid=(num_blocks,),
            in_specs=[in_spec, in_spec],
            out_specs=pl.BlockSpec((1, SUBLANES, LANES), lambda i: (i, 0, 0)),
        ),
        compiler_params=pltpu.CompilerParams(
            dimension_semantics=("parallel",),
            vmem_limit_bytes=32 * 1024 * 1024),
    )(pred_2d, target_2d)

    # Tiny final reduction (num_blocks * 1024 f32) + negation outside the kernel.
    return -jnp.sum(partials, dtype=jnp.float32)


def _reference(pred, target, *, alpha, gamma):
    pred = pred.astype(jnp.float32)
    target = target.astype(jnp.float32)
    weight = jnp.where(target == 0.0, 1.0 - alpha, 0.0)
    weight = jnp.where(target > 1e-5, alpha, weight)
    sigmoid_pred = jax.nn.sigmoid(pred)
    log_sigmoid = jax.nn.log_sigmoid(pred)
    log_sigmoid_inv = jax.nn.log_sigmoid(-pred)
    coef = weight * jnp.abs(sigmoid_pred - target) ** gamma
    loss = target * log_sigmoid + (1.0 - target) * log_sigmoid_inv
    return -jnp.sum(coef * loss)


if __name__ == "__main__":
    alpha, gamma = 0.25, 2.0

    key = jax.random.PRNGKey(0)
    k1, k2, k3 = jax.random.split(key, 3)
    shape = (2, 4, 16, 16)  # NCHW-shaped logits / soft targets

    pred = jax.random.normal(k1, shape, dtype=jnp.float32) * 2.0
    # soft targets in [0, 1], with some exact zeros so all weight branches hit
    target = jax.random.uniform(k2, shape, dtype=jnp.float32)
    zero_mask = jax.random.bernoulli(k3, 0.3, shape)
    target = jnp.where(zero_mask, 0.0, target)

    out = focal_loss_with_logits_neg_soft_loss(pred, target,
                                               alpha=alpha, gamma=gamma)
    out = jax.block_until_ready(out)
    ref = _reference(pred, target, alpha=alpha, gamma=gamma)
    assert jnp.allclose(out, ref, rtol=1e-5, atol=1e-5), (out, ref)

    # Ragged-tail case (size not a multiple of 128) exercises the sentinel pad.
    shape2 = (3, 5, 7, 11)
    k4, k5 = jax.random.split(k3)
    pred2 = jax.random.normal(k4, shape2, dtype=jnp.float32)
    target2 = jnp.where(jax.random.bernoulli(k5, 0.4, shape2), 0.0,
                        jax.random.uniform(k4, shape2, dtype=jnp.float32))
    out2 = jax.block_until_ready(
        focal_loss_with_logits_neg_soft_loss(pred2, target2,
                                             alpha=alpha, gamma=gamma))
    ref2 = _reference(pred2, target2, alpha=alpha, gamma=gamma)
    assert jnp.allclose(out2, ref2, rtol=1e-5, atol=1e-5), (out2, ref2)

    print("KERNEL_OK")
</pallas_src>

<mosaic_0001>
module attributes {stable_mosaic.version = 11 : i64} {
  func.func @_focal_loss_kernel(%arg0: i32, %arg1: memref<16x128xf32, #tpu.memory_space<vmem>>, %arg2: memref<16x128xf32, #tpu.memory_space<vmem>>, %arg3: memref<1x8x128xf32, #tpu.memory_space<vmem>>) attributes {dimension_semantics = [#tpu.dimension_semantics<parallel>], iteration_bounds = array<i64: 1>, scalar_prefetch = 0 : i64, scratch_operands = 0 : i64, tpu.core_type = #tpu.core_type<tc>, window_params = [{transform_indices = @transform_0, window_bounds = array<i64: 16, 128>}, {transform_indices = @transform_1, window_bounds = array<i64: 16, 128>}, {transform_indices = @transform_2, window_bounds = array<i64: 1, 8, 128>}]} {
    %c0 = arith.constant 0 : index
    %c0_0 = arith.constant 0 : index
    %0 = vector.load %arg1[%c0, %c0_0] : memref<16x128xf32, #tpu.memory_space<vmem>>, vector<16x128xf32>
    %c0_1 = arith.constant 0 : index
    %c0_2 = arith.constant 0 : index
    %1 = vector.load %arg2[%c0_1, %c0_2] : memref<16x128xf32, #tpu.memory_space<vmem>>, vector<16x128xf32>
    %cst = arith.constant 0.000000e+00 : f32
    %2 = vector.broadcast %cst : f32 to vector<16x128xf32>
    %3 = arith.cmpf oeq, %1, %2 : vector<16x128xf32>
    %cst_3 = arith.constant 7.500000e-01 : f32
    %cst_4 = arith.constant 0.000000e+00 : f32
    %4 = vector.broadcast %cst_3 : f32 to vector<16x128xf32>
    %5 = vector.broadcast %cst_4 : f32 to vector<16x128xf32>
    %6 = arith.select %3, %4, %5 : vector<16x128xi1>, vector<16x128xf32>
    %cst_5 = arith.constant 9.99999974E-6 : f32
    %7 = vector.broadcast %cst_5 : f32 to vector<16x128xf32>
    %8 = arith.cmpf ogt, %1, %7 : vector<16x128xf32>
    %cst_6 = arith.constant 2.500000e-01 : f32
    %9 = vector.broadcast %cst_6 : f32 to vector<16x128xf32>
    %10 = arith.select %8, %9, %6 : vector<16x128xi1>, vector<16x128xf32>
    %11 = math.absf %0 : vector<16x128xf32>
    %cst_7 = arith.constant 0.000000e+00 : f32
    %12 = vector.broadcast %cst_7 : f32 to vector<16x128xf32>
    %13 = arith.subf %12, %11 : vector<16x128xf32>
    %14 = math.exp %13 : vector<16x128xf32>
    %15 = math.log1p %14 : vector<16x128xf32>
    %cst_8 = arith.constant 0.000000e+00 : f32
    %16 = vector.broadcast %cst_8 : f32 to vector<16x128xf32>
    %17 = arith.minimumf %0, %16 : vector<16x128xf32>
    %18 = arith.subf %17, %15 : vector<16x128xf32>
    %cst_9 = arith.constant 0.000000e+00 : f32
    %19 = vector.broadcast %cst_9 : f32 to vector<16x128xf32>
    %20 = arith.subf %19, %0 : vector<16x128xf32>
    %cst_10 = arith.constant 0.000000e+00 : f32
    %21 = vector.broadcast %cst_10 : f32 to vector<16x128xf32>
    %22 = arith.minimumf %20, %21 : vector<16x128xf32>
    %23 = arith.subf %22, %15 : vector<16x128xf32>
    %cst_11 = arith.constant 1.000000e+00 : f32
    %24 = vector.broadcast %cst_11 : f32 to vector<16x128xf32>
    %25 = arith.addf %24, %14 : vector<16x128xf32>
    %cst_12 = arith.constant 1.000000e+00 : f32
    %26 = vector.broadcast %cst_12 : f32 to vector<16x128xf32>
    %27 = arith.divf %26, %25 : vector<16x128xf32>
    %cst_13 = arith.constant 0.000000e+00 : f32
    %28 = vector.broadcast %cst_13 : f32 to vector<16x128xf32>
    %29 = arith.cmpf oge, %0, %28 : vector<16x128xf32>
    %cst_14 = arith.constant 1.000000e+00 : f32
    %30 = vector.broadcast %cst_14 : f32 to vector<16x128xf32>
    %31 = arith.select %29, %30, %14 : vector<16x128xi1>, vector<16x128xf32>
    %32 = arith.mulf %31, %27 : vector<16x128xf32>
    %33 = arith.subf %32, %1 : vector<16x128xf32>
    %34 = math.absf %33 : vector<16x128xf32>
    %cst_15 = arith.constant 1.000000e+00 : f32
    %35 = vector.broadcast %cst_15 : f32 to vector<16x128xf32>
    %36 = arith.mulf %35, %34 : vector<16x128xf32>
    %37 = arith.mulf %36, %34 : vector<16x128xf32>
    %38 = arith.mulf %10, %37 : vector<16x128xf32>
    %39 = arith.mulf %1, %18 : vector<16x128xf32>
    %cst_16 = arith.constant 1.000000e+00 : f32
    %40 = vector.broadcast %cst_16 : f32 to vector<16x128xf32>
    %41 = arith.subf %40, %1 : vector<16x128xf32>
    %42 = arith.mulf %41, %23 : vector<16x128xf32>
    %43 = arith.addf %39, %42 : vector<16x128xf32>
    %44 = arith.mulf %38, %43 : vector<16x128xf32>
    %45 = vector.shape_cast %44 : vector<16x128xf32> to vector<2x8x128xf32>
    %cst_17 = arith.constant dense<0.000000e+00> : vector<8x128xf32>
    %46 = vector.multi_reduction <add>, %45, %cst_17 [0] : vector<2x8x128xf32> to vector<8x128xf32>
    %47 = vector.shape_cast %46 : vector<8x128xf32> to vector<1x8x128xf32>
    %c0_18 = arith.constant 0 : index
    %c0_19 = arith.constant 0 : index
    %c0_20 = arith.constant 0 : index
    %48 = vector.load %arg3[%c0_18, %c0_19, %c0_20] : memref<1x8x128xf32, #tpu.memory_space<vmem>>, vector<1x8x128xf32>
    tpu.vector_store %arg3[%c0_18, %c0_19, %c0_20], %47 {strides = array<i32>} : memref<1x8x128xf32, #tpu.memory_space<vmem>>, vector<1x8x128xf32>,
    return
  }
  func.func @transform_0(%arg0: i32) -> (i32, i32) {
    %c0_i32 = arith.constant 0 : i32
    %c0_i32_0 = arith.constant 0 : i32
    return %arg0, %c0_i32 : i32, i32
  }
  func.func @transform_1(%arg0: i32) -> (i32, i32) {
    %c0_i32 = arith.constant 0 : i32
    %c0_i32_0 = arith.constant 0 : i32
    return %arg0, %c0_i32 : i32, i32
  }
  func.func @transform_2(%arg0: i32) -> (i32, i32, i32) {
    %c0_i32 = arith.constant 0 : i32
    %c0_i32_0 = arith.constant 0 : i32
    %c0_i32_1 = arith.constant 0 : i32
    return %arg0, %c0_i32, %c0_i32_0 : i32, i32, i32
  }
}

</mosaic_0001>

<bundles_post_ra>
// kernel: tpu_custom_call.1
= control target key start
LH: loop header
LB: loop body
LE: loop exit
PB: predicated region body
PF: predicated region fallthrough
CT: control target
= control target key end

     0   :  { %7 = vsyncpa [#allocation3], 0  ;;  %s353_s0 = inlined_call_operand.hbm [shape: f32[16,128], index: 0, kind: input, shape index: {}]   ;;  %s354_s1 = inlined_call_operand.hbm [shape: f32[16,128], index: 1, kind: input, shape index: {}]   ;;  %s355_s2 = inlined_call_operand.hbm [shape: f32[1,8,128], index: 2, kind: output, shape index: {}]  }
   0x1   :  { %8 = vsyncpa [#allocation6], 0 }
   0x2   :  { %9 = vsyncpa [#allocation4], 0  ;;  %s14_s11 = sshll.u32 %s353_s0, 4  ;;  %s264_s12 = smov [#allocation2]   ;;  %s15_s11 = int_to_ptr.hbm [resolvable:$true] %s14_s11 }
   0x3   :  { %s16_s13 = sshll.u32 %s264_s12, 4  ;;  %s27_s16 = sshll.u32 %s354_s1, 4  ;;  %s17_s13 = int_to_ptr.vmem [resolvable:$true] %s16_s13  ;;  %s28_s16 = int_to_ptr.hbm [resolvable:$true] %s27_s16 }
   0x4   :  { %s265_s17 = smov 128   ;;  %s266_s18 = smov 8  }
   0x5   :  { %22 = dma.hbm_to_vmem [thread:$0]  %s15_s11, 256, %s17_s13, [#allocation3], %s265_s17, %s265_s17, %s266_s18  }
   0x6   :  { %s267_s19 = smov [#allocation5]  }
   0x7   :  { %s29_s20 = sshll.u32 %s267_s19, 4  ;;  %s30_s20 = int_to_ptr.vmem [resolvable:$true] %s29_s20 }
   0x8   :  { %35 = dma.hbm_to_vmem [thread:$0]  %s28_s16, 256, %s30_s20, [#allocation6], %s265_s17, %s265_s17, %s266_s18  }
   0x9   :  { %258 = dma.done.wait [#allocation3], 256  }
   0xa   :  { %259 = vsyncadd [#allocation3], 4294967040 }
   0xb   :  { %260 = dma.done.wait [#allocation6], 256  }
   0xc   :  { %261 = vsyncadd [#allocation6], 4294967040  ;;  %v291_v0 = vld [vmem:[#allocation2] sm:$0xff]  ;;  %v293_v1 = vld [vmem:[#allocation2 + $0x8] sm:$0xff]  ;;  %s269_s0 = smov [#allocation7]   ;;  %s157_s23 = sshll.u32 %s355_s2, 4  ;;  %s158_s23 = int_to_ptr.hbm [resolvable:$true] %s157_s23 }
   0xd   :  { %v56_v2 = vand.u32 2147483647, %v291_v0  ;;  %v57_v3 = vand.u32 2147483647, %v293_v1  ;;  %v82_v20 = vmin.f32 %v291_v0, 0.0  ;;  %v83_v21 = vmin.f32 %v293_v1, 0.0 }
   0xe   :  { %v86_v22 = vsub.f32 0.0, %v291_v0  ;;  %v305_v24 = vld [vmem:[#allocation5] sm:$0xff]  ;;  %v87_v26 = vsub.f32 0.0, %v293_v1  ;;  %vm124_vm2 = vcmp.ge.f32.partialorder %v291_v0, 0.0  ;;  %vm125_vm8 = vcmp.ge.f32.partialorder %v293_v1, 0.0  ;;  %v47_v49 = vld [vmem:[#allocation5 + $0x8] sm:$0xff] }
   0xf   :  { %v58_v4 = vsub.f32 0.0, %v56_v2  ;;  %v59_v5 = vsub.f32 0.0, %v57_v3  ;;  %vm48_vm3 = vcmp.eq.f32.partialorder %v305_v24, 0.0  ;;  %v140_v48 = vsub.f32 1.0, %v305_v24  ;;  %s155_s1 = sshll.u32 %s269_s0, 4  ;;  %s156_s1 = int_to_ptr.vmem [resolvable:$true] %s155_s1 }
  0x10   :  { %v88_v41 = vmin.f32 %v86_v22, 0.0  ;;  %v89_v42 = vmin.f32 %v87_v26, 0.0  ;;  %v141_v56 = vsub.f32 1.0, %v47_v49  ;;  %vm49_vm13 = vcmp.eq.f32.partialorder %v47_v49, 0.0 }
  0x11   :  { %v60_v6 = vmul.f32 1.442695, %v58_v4  ;;  %v62_v7 = vmul.f32 1.442695, %v59_v5  ;;  %v268_v4 = vmov 0.0  }
  0x12   :  { %v50_v5 = vsel %vm48_vm3, 0.75, %v268_v4  ;;  %vm52_vm14 = vcmp.gt.f32.partialorder %v305_v24, 1e-05  ;;  %vm53_vm15 = vcmp.gt.f32.partialorder %v47_v49, 1e-05 }
  0x13   :  { %174 = vpow2.f32 %v60_v6 }
  0x14   :  { %176 = vpow2.f32 %v62_v7 }
  0x19   :  { %v175_v8 = vpop.eup %174 }
  0x1a   :  { %v297_v9 = vpop.eup %176  ;;  %v64_v10 = vadd.f32 1.0, %v175_v8  ;;  %v67_v12 = vmul.f32 -0.5, %v175_v8  ;;  %v70_v14 = vand.u32 2147483647, %v175_v8  ;;  %v126_v55 = vsel %vm124_vm2, 1.0, %v175_v8 }
  0x1b   :  { %v73_v11 = vadd.f32 1.0, %v297_v9  ;;  %v76_v13 = vmul.f32 -0.5, %v297_v9  ;;  %v79_v16 = vand.u32 2147483647, %v297_v9  ;;  %v127_v60 = vsel %vm125_vm8, 1.0, %v297_v9 }
  0x1c   :  { %178 = vlog2.f32 %v64_v10  ;;  %v68_v15 = vadd.f32 1.0, %v67_v12  ;;  %vm307_vm0 = vcmp.lt.f32.partialorder %v70_v14, 0.0004427343  ;;  %vm99_vm1 = vweird.f32 %v64_v10 }
  0x1d   :  { %180 = vlog2.f32 %v73_v11  ;;  %v77_v18 = vadd.f32 1.0, %v76_v13  ;;  %vm314_vm4 = vcmp.lt.f32.partialorder %v79_v16, 0.0004427343  ;;  %v103_v31 = vand.u32 2147483647, %v64_v10 }
  0x1e   :  { %182 = vrcp.f32 %v64_v10  ;;  %v69_v28 = vmul.f32 %v175_v8, %v68_v15  ;;  %v105_v34 = vand.u32 2147483648, %v64_v10  ;;  %v120_v38 = vand.u32 2147483648, %v73_v11 }
  0x1f   :  { %184 = vrcp.f32 %v73_v11  ;;  %v78_v33 = vmul.f32 %v297_v9, %v77_v18  ;;  %vm114_vm6 = vweird.f32 %v73_v11  ;;  %v118_v40 = vand.u32 2147483647, %v73_v11 }
  0x20   :  { %v106_v46 = vor.u32 1.1754944e-38, %v105_v34  ;;  %vm104_vm10 = vcmp.eq.f32.partialorder %v103_v31, 8.507059e+37  ;;  %v121_v53 = vor.u32 1.1754944e-38, %v120_v38  ;;  %v51_v9 = vsel %vm49_vm13, 0.75, %v268_v4 }
  0x21   :  { %vm119_vm12 = vcmp.eq.f32.partialorder %v118_v40, 8.507059e+37  ;;  %v54_v14 = vsel %vm52_vm14, 0.25, %v50_v5  ;;  %v55_v16 = vsel %vm53_vm15, 0.25, %v51_v9 }
  0x22   :  { %v179_v17 = vpop.eup %178 }
  0x23   :  { %v181_v19 = vpop.eup %180  ;;  %v66_v32 = vmul.f32 0.6931472, %v179_v17 }
  0x24   :  { %v183_v23 = vpop.eup %182  ;;  %v75_v36 = vmul.f32 0.6931472, %v181_v19 }
  0x25   :  { %v185_v27 = vpop.eup %184  ;;  %v95_v30 = vmul.f32 %v183_v23, %v64_v10  ;;  %vm100_vm5 = vweird.f32 %v183_v23  ;;  %v72_v44 = vsel %vm307_vm0, %v69_v28, %v66_v32 }
  0x26   :  { %v110_v35 = vmul.f32 %v185_v27, %v73_v11  ;;  %vm115_vm7 = vweird.f32 %v185_v27  ;;  %vm323_vm9 = vmor %vm99_vm1, %vm100_vm5  ;;  %v81_v50 = vsel %vm314_vm4, %v78_v33, %v75_v36  ;;  %v84_v57 = vsub.f32 %v82_v20, %v72_v44 }
  0x27   :  { %v96_v37 = vsub.f32 1.0, %v95_v30  ;;  %vm332_vm11 = vmor %vm114_vm6, %vm115_vm7  ;;  %v90_v58 = vsub.f32 %v88_v41, %v72_v44  ;;  %v85_v61 = vsub.f32 %v83_v21, %v81_v50  ;;  %v91_v62 = vsub.f32 %v89_v42, %v81_v50 }
  0x28   :  { %v111_v39 = vsub.f32 1.0, %v110_v35  ;;  %v138_v7 = vmul.f32 %v84_v57, %v305_v24 }
  0x29   :  { %v97_v43 = vmul.f32 %v183_v23, %v96_v37  ;;  %v142_v8 = vmul.f32 %v140_v48, %v90_v58  ;;  %v139_v11 = vmul.f32 %v85_v61, %v47_v49  ;;  %v143_v12 = vmul.f32 %v141_v56, %v91_v62 }
  0x2a   :  { %v112_v47 = vmul.f32 %v185_v27, %v111_v39 }
  0x2b   :  { %v98_v51 = vadd.f32 %v183_v23, %v97_v43  ;;  %v144_v18 = vadd.f32 %v142_v8, %v138_v7  ;;  %v145_v20 = vadd.f32 %v143_v12, %v139_v11 }
  0x2c   :  { %v113_v54 = vadd.f32 %v185_v27, %v112_v47 }
  0x2d   :  { %v102_v59 = vsel %vm323_vm9, %v183_v23, %v98_v51 }
  0x2e   :  { %v107_v63 = vsel %vm104_vm10, %v106_v46, %v102_v59  ;;  %v117_v2 = vsel %vm332_vm11, %v185_v27, %v113_v54 }
  0x2f   :  { %v122_v3 = vsel %vm119_vm12, %v121_v53, %v117_v2  ;;  %v128_v0 = vmul.f32 %v126_v55, %v107_v63 }
  0x30   :  { %v129_v6 = vmul.f32 %v127_v60, %v122_v3 }
  0x31   :  { %v130_v1 = vsub.f32 %v128_v0, %v305_v24 }
  0x32   :  { %v131_v10 = vsub.f32 %v129_v6, %v47_v49 }
  0x33   :  { %v132_v13 = vand.u32 2147483647, %v130_v1 }
  0x34   :  { %v133_v15 = vand.u32 2147483647, %v131_v10 }
  0x35   :  { %v134_v17 = vmul.f32 %v132_v13, %v132_v13 }
  0x36   :  { %v135_v19 = vmul.f32 %v133_v15, %v133_v15 }
  0x37   :  { %v136_v21 = vmul.f32 %v134_v17, %v54_v14 }
  0x38   :  { %v137_v22 = vmul.f32 %v135_v19, %v55_v16 }
  0x39   :  { %v146_v23 = vmul.f32 %v144_v18, %v136_v21 }
  0x3a   :  { %v147_v24 = vmul.f32 %v145_v20, %v137_v22 }
  0x3c   :  { %v148_v25 = vadd.f32 %v147_v24, %v146_v23 }
  0x3e   :  { %149 = vst [vmem:[#allocation7] sm:$0xff] %v148_v25 }
  0x3f   :  { %160 = dma.vmem_to_hbm [thread:$0]  %s156_s1, 128, %s158_s23, [#allocation4]  }
  0x40   :  { %262 = dma.done.wait [#allocation4], 128  }
  0x41   :  { %263 = vsyncadd [#allocation4], 4294967168 }
  0x42   :  { %165 = vsyncpa [#allocation3], 1 }
  0x43   :  { %166 = vsyncpa [#allocation6], 1 }
  0x44   :  { %167 = vsyncpa [#allocation4], 1 }

</bundles_post_ra>
